<compile_context>
chip_gen: v7x
topology: tpu7x:2x2x1
jax: 0.10.0
libtpu: 0.0.40
codegen_flags: <defaults>
</compile_context>

<pallas_src>
import jax
import jax.numpy as jnp
from jax.experimental import pallas as pl
from jax.experimental.pallas import tpu as pltpu


def soft_attention_kernel(enc_ref, dec_ref,
                          we_ref, wd_ref, bias_ref,
                          wf_ref,
                          ctx_ref, alpha_ref):
    # enc_ref:   (BN, P, E)   encoder_out slab for BN batch elements
    # dec_ref:   (BN, 1, D)   decoder_hidden
    # we_ref:    (E, A)       encoder_att weight
    # wd_ref:    (D, A)       decoder_att weight
    # bias_ref:  (1, A)       encoder_att bias + decoder_att bias (pre-summed)
    # wf_ref:    (1, A)       full_att weight as a row vector (bias dropped)
    # ctx_ref:   (BN, 1, E)   context output
    # alpha_ref: (BN, 1, P)   attention weights output (lane-dense in P)
    bn, p, e_dim = enc_ref.shape
    a = enc_ref[...]                                   # [BN, P, E]
    h = dec_ref[...][:, 0, :]                          # [BN, D]

    # Steps 1-2: Linear layers on the MXU, f32 accumulation.  The encoder slab
    # is flattened so the MXU sees M = BN*P rows instead of P.  The combined
    # bias is added once on the small decoder projection (both biases end up
    # in the same pre-ReLU sum, so this is exactly equivalent).
    a2d = a.reshape(bn * p, e_dim)                     # [BN*P, E]
    att1 = jnp.dot(a2d, we_ref[...],
                   preferred_element_type=jnp.float32)                    # [BN*P, A]
    att2 = jnp.dot(h, wd_ref[...],
                   preferred_element_type=jnp.float32) \
        + bias_ref[...].astype(jnp.float32)                               # [BN, A]

    # Steps 3-4: broadcast-add over pixels + ReLU (f32 on the VPU).
    relu_out = jnp.maximum(att1.reshape(bn, p, -1) + att2[:, None, :], 0.0)  # [BN,P,A]

    # Step 5: full_att as a VPU multiply + cross-lane reduce (no degenerate
    # output-width-1 MXU matmul).  The bias is omitted: softmax is
    # shift-invariant, so it cannot change alpha or context.
    scores = jnp.sum(relu_out * wf_ref[...].astype(jnp.float32), axis=-1)    # [BN, P]

    # Step 6: softmax over the pixel (lane) axis in f32; reciprocal on the EUP.
    m = jnp.max(scores, axis=-1, keepdims=True)
    ex = jnp.exp(scores - m)
    denom = jnp.sum(ex, axis=-1, keepdims=True)
    alpha = ex * pl.reciprocal(denom, approx=True)     # [BN, P]

    # Step 7: context via an MXU contraction (avoids a [BN, P, E] f32
    # temporary and the VPU multiplies / sublane reduce).
    ctx = jnp.einsum('bqp,bpe->bqe',
                     alpha[:, None, :].astype(a.dtype), a,
                     preferred_element_type=jnp.float32)  # [BN, 1, E]

    ctx_ref[...] = ctx.astype(ctx_ref.dtype)
    alpha_ref[...] = alpha[:, None, :].astype(alpha_ref.dtype)


def _pick_block_n(n, p, e, itemsize, vmem_budget_bytes=8 * 1024 * 1024,
                  prefer_min_grid=2):
    """Largest divisor of n whose double-buffered encoder block plus rough f32
    intermediates fit the budget, keeping >= prefer_min_grid grid steps when
    possible (so the batch axis can be sharded across TensorCores)."""
    def cost(bn):
        enc = 2 * bn * p * e * itemsize        # double-buffered encoder DMA
        tmp = bn * p * max(e, 128) * 4         # rough f32 intermediates
        return enc + tmp
    divisors = [d for d in range(1, n + 1) if n % d == 0]
    feasible = [d for d in divisors if cost(d) <= vmem_budget_bytes] or [1]
    preferred = [d for d in feasible if n // d >= prefer_min_grid] or feasible
    return max(preferred)


def soft_attention(encoder_out, decoder_hidden, params, *,
                   block_n=None, mxu_dtype=None):
    """encoder_out: [N,P,E], decoder_hidden: [N,D] -> (context [N,E], alpha [N,P]).

    params: we [E,A], be [1,A], wd [D,A], bd [1,A], wf [A,1], bf [1,1]
    (weights stored as [in, out], i.e. transposed vs torch nn.Linear.weight).
    mxu_dtype: optional dtype (e.g. jnp.bfloat16) to feed the MXU on v6e/v7x;
    accumulation and softmax/context math stay f32 inside the kernel.
    """
    N, P, E = encoder_out.shape
    D = decoder_hidden.shape[-1]
    A = params["we"].shape[1]
    out_dtype = encoder_out.dtype

    # Pre-sum the two attention biases (they are added into the same pre-ReLU
    # sum, so a single [1, A] bias applied on the decoder projection is exact).
    bias_sum = params["be"] + params["bd"]                       # [1, A]
    we, wd = params["we"], params["wd"]
    wf_row = params["wf"].reshape(1, A)
    # params["bf"] is intentionally NOT passed to the kernel: softmax is
    # shift-invariant, so the full_att bias has no effect on alpha or context.

    if mxu_dtype is not None:
        encoder_out = encoder_out.astype(mxu_dtype)
        decoder_hidden = decoder_hidden.astype(mxu_dtype)
        we = we.astype(mxu_dtype)
        wd = wd.astype(mxu_dtype)
        bias_sum = bias_sum.astype(mxu_dtype)
        wf_row = wf_row.astype(mxu_dtype)

    if block_n is None:
        block_n = _pick_block_n(N, P, E, jnp.dtype(encoder_out.dtype).itemsize)
    assert N % block_n == 0, (N, block_n)
    grid = (N // block_n,)

    dec3 = decoder_hidden.reshape(N, 1, D)

    grid_spec = pltpu.PrefetchScalarGridSpec(
        num_scalar_prefetch=0,
        grid=grid,
        in_specs=[
            pl.BlockSpec((block_n, P, E), lambda n: (n, 0, 0)),   # encoder_out
            pl.BlockSpec((block_n, 1, D), lambda n: (n, 0, 0)),   # decoder_hidden
            pl.BlockSpec((E, A), lambda n: (0, 0)),               # W_enc
            pl.BlockSpec((D, A), lambda n: (0, 0)),               # W_dec
            pl.BlockSpec((1, A), lambda n: (0, 0)),               # b_enc + b_dec
            pl.BlockSpec((1, A), lambda n: (0, 0)),               # W_full (row)
        ],
        out_specs=[
            pl.BlockSpec((block_n, 1, E), lambda n: (n, 0, 0)),   # context
            pl.BlockSpec((block_n, 1, P), lambda n: (n, 0, 0)),   # alpha (lane-dense)
        ],
    )

    ctx3, alpha3 = pl.pallas_call(
        soft_attention_kernel,
        out_shape=(jax.ShapeDtypeStruct((N, 1, E), out_dtype),
                   jax.ShapeDtypeStruct((N, 1, P), out_dtype)),
        grid_spec=grid_spec,
        compiler_params=pltpu.CompilerParams(
            dimension_semantics=("parallel",),
            vmem_limit_bytes=32 * 1024 * 1024),
    )(encoder_out, dec3, we, wd, bias_sum, wf_row)

    return ctx3.reshape(N, E), alpha3.reshape(N, P)


def reference(encoder_out, decoder_hidden, params):
    att1 = encoder_out @ params["we"] + params["be"]
    att2 = decoder_hidden @ params["wd"] + params["bd"]
    relu_out = jnp.maximum(att1 + att2[:, None, :], 0.0)
    att = (relu_out @ params["wf"] + params["bf"])[..., 0]
    alpha = jax.nn.softmax(att, axis=1)
    context = jnp.sum(encoder_out * alpha[..., None], axis=1)
    return context, alpha


if __name__ == "__main__":
    # Small deterministic shapes: N=4 (-> BN=2, grid=2), feature_map=4 -> P=16,
    # E=32, D=24, A=16.
    N, P, E, D, A = 4, 16, 32, 24, 16
    key = jax.random.PRNGKey(0)
    k = jax.random.split(key, 8)

    encoder_out = jax.random.normal(k[0], (N, P, E), dtype=jnp.float32)
    decoder_hidden = jax.random.normal(k[1], (N, D), dtype=jnp.float32)

    params = {
        "we": jax.random.normal(k[2], (E, A), dtype=jnp.float32) * 0.1,
        "be": jax.random.normal(k[3], (1, A), dtype=jnp.float32) * 0.1,
        "wd": jax.random.normal(k[4], (D, A), dtype=jnp.float32) * 0.1,
        "bd": jax.random.normal(k[5], (1, A), dtype=jnp.float32) * 0.1,
        "wf": jax.random.normal(k[6], (A, 1), dtype=jnp.float32) * 0.1,
        "bf": jax.random.normal(k[7], (1, 1), dtype=jnp.float32) * 0.1,
    }

    ref_ctx, ref_alpha = reference(encoder_out, decoder_hidden, params)

    # f32 path (approx reciprocal only rescales the shared softmax denominator,
    # so a modest tolerance is enough to catch real structural bugs).
    context, alpha = soft_attention(encoder_out, decoder_hidden, params)
    context, alpha = jax.block_until_ready((context, alpha))
    assert context.shape == (N, E) and alpha.shape == (N, P)
    assert jnp.allclose(context, ref_ctx, atol=5e-3, rtol=5e-3), \
        float(jnp.max(jnp.abs(context - ref_ctx)))
    assert jnp.allclose(alpha, ref_alpha, atol=5e-3, rtol=5e-3), \
        float(jnp.max(jnp.abs(alpha - ref_alpha)))

    # bf16 MXU feed (v6e/v7x production path); accumulation stays f32.
    ctx_bf, alpha_bf = soft_attention(encoder_out, decoder_hidden, params,
                                      mxu_dtype=jnp.bfloat16)
    ctx_bf, alpha_bf = jax.block_until_ready((ctx_bf, alpha_bf))
    assert jnp.allclose(ctx_bf, ref_ctx, atol=5e-2, rtol=5e-2), \
        float(jnp.max(jnp.abs(ctx_bf - ref_ctx)))
    assert jnp.allclose(alpha_bf, ref_alpha, atol=5e-2, rtol=5e-2), \
        float(jnp.max(jnp.abs(alpha_bf - ref_alpha)))

    print("KERNEL_OK")
</pallas_src>

<mosaic_0001>
module attributes {stable_mosaic.version = 11 : i64} {
  func.func @soft_attention_kernel(%arg0: i32, %arg1: memref<2x16x32xf32, #tpu.memory_space<vmem>>, %arg2: memref<2x1x24xf32, #tpu.memory_space<vmem>>, %arg3: memref<32x16xf32, #tpu.memory_space<vmem>>, %arg4: memref<24x16xf32, #tpu.memory_space<vmem>>, %arg5: memref<1x16xf32, #tpu.memory_space<vmem>>, %arg6: memref<1x16xf32, #tpu.memory_space<vmem>>, %arg7: memref<2x1x32xf32, #tpu.memory_space<vmem>>, %arg8: memref<2x1x16xf32, #tpu.memory_space<vmem>>) attributes {dimension_semantics = [#tpu.dimension_semantics<parallel>], iteration_bounds = array<i64: 2>, scalar_prefetch = 0 : i64, scratch_operands = 0 : i64, tpu.core_type = #tpu.core_type<tc>, window_params = [{transform_indices = @transform_0, window_bounds = array<i64: 2, 16, 32>}, {transform_indices = @transform_1, window_bounds = array<i64: 2, 1, 24>}, {pipeline_mode = #tpu.pipeline_mode<synchronous>, transform_indices = @transform_2, window_bounds = array<i64: 32, 16>}, {pipeline_mode = #tpu.pipeline_mode<synchronous>, transform_indices = @transform_3, window_bounds = array<i64: 24, 16>}, {pipeline_mode = #tpu.pipeline_mode<synchronous>, transform_indices = @transform_4, window_bounds = array<i64: 1, 16>}, {pipeline_mode = #tpu.pipeline_mode<synchronous>, transform_indices = @transform_5, window_bounds = array<i64: 1, 16>}, {transform_indices = @transform_6, window_bounds = array<i64: 2, 1, 32>}, {transform_indices = @transform_7, window_bounds = array<i64: 2, 1, 16>}]} {
    %c0 = arith.constant 0 : index
    %c0_0 = arith.constant 0 : index
    %c0_1 = arith.constant 0 : index
    %0 = vector.load %arg1[%c0, %c0_0, %c0_1] : memref<2x16x32xf32, #tpu.memory_space<vmem>>, vector<2x16x32xf32>
    %c0_2 = arith.constant 0 : index
    %c0_3 = arith.constant 0 : index
    %c0_4 = arith.constant 0 : index
    %1 = vector.load %arg2[%c0_2, %c0_3, %c0_4] : memref<2x1x24xf32, #tpu.memory_space<vmem>>, vector<2x1x24xf32>
    %2 = vector.shape_cast %1 : vector<2x1x24xf32> to vector<2x24xf32>
    %3 = vector.shape_cast %0 : vector<2x16x32xf32> to vector<32x32xf32>
    %c0_5 = arith.constant 0 : index
    %c0_6 = arith.constant 0 : index
    %4 = vector.load %arg3[%c0_5, %c0_6] : memref<32x16xf32, #tpu.memory_space<vmem>>, vector<32x16xf32>
    %cst = arith.constant dense<0.000000e+00> : vector<32x16xf32>
    %5 = tpu.matmul %3, %4, %cst {dimension_numbers = #tpu.dot_dimension_numbers<[1], [0], [0], [1], [0, 0, 1, 1], [], []>} : vector<32x32xf32>, vector<32x16xf32>, vector<32x16xf32> -> vector<32x16xf32>
    %c0_7 = arith.constant 0 : index
    %c0_8 = arith.constant 0 : index
    %6 = vector.load %arg4[%c0_7, %c0_8] : memref<24x16xf32, #tpu.memory_space<vmem>>, vector<24x16xf32>
    %cst_9 = arith.constant dense<0.000000e+00> : vector<2x16xf32>
    %7 = tpu.matmul %2, %6, %cst_9 {dimension_numbers = #tpu.dot_dimension_numbers<[1], [0], [0], [1], [0, 0, 1, 1], [], []>} : vector<2x24xf32>, vector<24x16xf32>, vector<2x16xf32> -> vector<2x16xf32>
    %c0_10 = arith.constant 0 : index
    %c0_11 = arith.constant 0 : index
    %8 = vector.load %arg5[%c0_10, %c0_11] : memref<1x16xf32, #tpu.memory_space<vmem>>, vector<1x16xf32>
    %9 = vector.broadcast %8 : vector<1x16xf32> to vector<2x16xf32>
    %10 = arith.addf %7, %9 : vector<2x16xf32>
    %11 = vector.shape_cast %5 : vector<32x16xf32> to vector<2x16x16xf32>
    %12 = vector.shape_cast %10 : vector<2x16xf32> to vector<2x1x16xf32>
    %13 = vector.broadcast %12 : vector<2x1x16xf32> to vector<2x16x16xf32>
    %14 = arith.addf %11, %13 : vector<2x16x16xf32>
    %cst_12 = arith.constant 0.000000e+00 : f32
    %15 = vector.broadcast %cst_12 : f32 to vector<2x16x16xf32>
    %16 = arith.maximumf %14, %15 : vector<2x16x16xf32>
    %c0_13 = arith.constant 0 : index
    %c0_14 = arith.constant 0 : index
    %17 = vector.load %arg6[%c0_13, %c0_14] : memref<1x16xf32, #tpu.memory_space<vmem>>, vector<1x16xf32>
    %18 = vector.shape_cast %17 : vector<1x16xf32> to vector<1x1x16xf32>
    %19 = vector.broadcast %18 : vector<1x1x16xf32> to vector<2x16x16xf32>
    %20 = arith.mulf %16, %19 : vector<2x16x16xf32>
    %cst_15 = arith.constant dense<0.000000e+00> : vector<2x16xf32>
    %21 = vector.multi_reduction <add>, %20, %cst_15 [2] : vector<2x16x16xf32> to vector<2x16xf32>
    %cst_16 = arith.constant dense<0xFF800000> : vector<2xf32>
    %22 = vector.multi_reduction <maximumf>, %21, %cst_16 [1] : vector<2x16xf32> to vector<2xf32>
    %23 = vector.shape_cast %22 : vector<2xf32> to vector<2x1xf32>
    %24 = vector.broadcast %23 : vector<2x1xf32> to vector<2x16xf32>
    %25 = arith.subf %21, %24 : vector<2x16xf32>
    %26 = math.exp %25 : vector<2x16xf32>
    %cst_17 = arith.constant dense<0.000000e+00> : vector<2xf32>
    %27 = vector.multi_reduction <add>, %26, %cst_17 [1] : vector<2x16xf32> to vector<2xf32>
    %28 = vector.shape_cast %27 : vector<2xf32> to vector<2x1xf32>
    %29 = tpu.reciprocal %28 {approx = true} : vector<2x1xf32> -> vector<2x1xf32>
    %30 = vector.broadcast %29 : vector<2x1xf32> to vector<2x16xf32>
    %31 = arith.mulf %26, %30 : vector<2x16xf32>
    %32 = vector.shape_cast %31 : vector<2x16xf32> to vector<2x1x16xf32>
    "tpu.trace_start"() <{level = 10 : i32, message = "bqp,bpe->bqe"}> : () -> ()
    %cst_18 = arith.constant dense<0.000000e+00> : vector<2x1x32xf32>
    %33 = tpu.matmul %32, %0, %cst_18 {dimension_numbers = #tpu.dot_dimension_numbers<[2], [1], [1], [2], [0, 0, 0, 1, 1, 2], [0], [0]>} : vector<2x1x16xf32>, vector<2x16x32xf32>, vector<2x1x32xf32> -> vector<2x1x32xf32>
    "tpu.trace_stop"() : () -> ()
    %c0_19 = arith.constant 0 : index
    %c0_20 = arith.constant 0 : index
    %c0_21 = arith.constant 0 : index
    %34 = vector.load %arg7[%c0_19, %c0_20, %c0_21] : memref<2x1x32xf32, #tpu.memory_space<vmem>>, vector<2x1x32xf32>
    tpu.vector_store %arg7[%c0_19, %c0_20, %c0_21], %33 {strides = array<i32>} : memref<2x1x32xf32, #tpu.memory_space<vmem>>, vector<2x1x32xf32>,
    %35 = vector.shape_cast %31 : vector<2x16xf32> to vector<2x1x16xf32>
    %c0_22 = arith.constant 0 : index
    %c0_23 = arith.constant 0 : index
    %c0_24 = arith.constant 0 : index
    %36 = vector.load %arg8[%c0_22, %c0_23, %c0_24] : memref<2x1x16xf32, #tpu.memory_space<vmem>>, vector<2x1x16xf32>
    tpu.vector_store %arg8[%c0_22, %c0_23, %c0_24], %35 {strides = array<i32>} : memref<2x1x16xf32, #tpu.memory_space<vmem>>, vector<2x1x16xf32>,
    return
  }
  func.func @transform_0(%arg0: i32) -> (i32, i32, i32) {
    %c0_i32 = arith.constant 0 : i32
    %c0_i32_0 = arith.constant 0 : i32
    %c0_i32_1 = arith.constant 0 : i32
    return %arg0, %c0_i32, %c0_i32_0 : i32, i32, i32
  }
  func.func @transform_1(%arg0: i32) -> (i32, i32, i32) {
    %c0_i32 = arith.constant 0 : i32
    %c0_i32_0 = arith.constant 0 : i32
    %c0_i32_1 = arith.constant 0 : i32
    return %arg0, %c0_i32, %c0_i32_0 : i32, i32, i32
  }
  func.func @transform_2(%arg0: i32) -> (i32, i32) {
    %c0_i32 = arith.constant 0 : i32
    %c0_i32_0 = arith.constant 0 : i32
    %c0_i32_1 = arith.constant 0 : i32
    return %c0_i32, %c0_i32_0 : i32, i32
  }
  func.func @transform_3(%arg0: i32) -> (i32, i32) {
    %c0_i32 = arith.constant 0 : i32
    %c0_i32_0 = arith.constant 0 : i32
    %c0_i32_1 = arith.constant 0 : i32
    return %c0_i32, %c0_i32_0 : i32, i32
  }
  func.func @transform_4(%arg0: i32) -> (i32, i32) {
    %c0_i32 = arith.constant 0 : i32
    %c0_i32_0 = arith.constant 0 : i32
    %c0_i32_1 = arith.constant 0 : i32
    return %c0_i32, %c0_i32_0 : i32, i32
  }
  func.func @transform_5(%arg0: i32) -> (i32, i32) {
    %c0_i32 = arith.constant 0 : i32
    %c0_i32_0 = arith.constant 0 : i32
    %c0_i32_1 = arith.constant 0 : i32
    return %c0_i32, %c0_i32_0 : i32, i32
  }
  func.func @transform_6(%arg0: i32) -> (i32, i32, i32) {
    %c0_i32 = arith.constant 0 : i32
    %c0_i32_0 = arith.constant 0 : i32
    %c0_i32_1 = arith.constant 0 : i32
    return %arg0, %c0_i32, %c0_i32_0 : i32, i32, i32
  }
  func.func @transform_7(%arg0: i32) -> (i32, i32, i32) {
    %c0_i32 = arith.constant 0 : i32
    %c0_i32_0 = arith.constant 0 : i32
    %c0_i32_1 = arith.constant 0 : i32
    return %arg0, %c0_i32, %c0_i32_0 : i32, i32, i32
  }
}

</mosaic_0001>

<bundles_post_ra>
// kernel: tpu_custom_call.1
= control target key start
LH: loop header
LB: loop body
LE: loop exit
PB: predicated region body
PF: predicated region fallthrough
CT: control target
= control target key end

     0   :  { %13 = vsyncpa [#allocation3], 0  ;;  %s1581_s0 = inlined_call_operand.vmem [shape: f32[4,16,32], index: 0, kind: input, shape index: {}]   ;;  %s1582_s1 = inlined_call_operand.vmem [shape: f32[4,1,24], index: 1, kind: input, shape index: {}]   ;;  %s1583_s2 = inlined_call_operand.vmem [shape: f32[32,16], index: 2, kind: input, shape index: {}]   ;;  %s1584_s3 = inlined_call_operand.vmem [shape: f32[24,16], index: 3, kind: input, shape index: {}]   ;;  %s1585_s4 = inlined_call_operand.vmem [shape: f32[1,16], index: 4, kind: input, shape index: {}]   ;;  %s1586_s5 = inlined_call_operand.vmem [shape: f32[1,16], index: 5, kind: input, shape index: {}]   ;;  %s1587_s6 = inlined_call_operand.hbm [shape: f32[4,1,32], index: 6, kind: output, shape index: {0}]   ;;  %s1588_s7 = inlined_call_operand.hbm [shape: f32[4,1,16], index: 7, kind: output, shape index: {1}]  }
   0x1   :  { %15 = vsyncpa [#allocation3 + $0x1], 0 }
   0x2   :  { %16 = vsyncpa [#allocation5], 0 }
   0x3   :  { %18 = vsyncpa [#allocation5 + $0x1], 0  ;;  %s1332_s24 = smov 0   ;;  %s1334_s25 = smov 0  }
   0x4   :  { %s1336_s26 = smov 0   ;;  %s1338_s27 = smov 0  }
   0x5 LB: > { %s1353_s28 = sadd.s32 4294967295, %s1281_s27   ;;  %s1022_s29 = sadd.s32 4294967294, %s1281_s27   ;;  %s1281_s27 = sphi %s1338_s27, %s1594_s27   ;;  %s1277_s26 = sphi %s1336_s26, %s1593_s26   ;;  %s1273_s25 = sphi %s1334_s25, %s1592_s25   ;;  %s1269_s24 = sphi %s1332_s24, %s1591_s24  }
   0x6   : > { %s1357_s30 = sadd.s32 1, %s1281_s27   ;;  %s167_s8 = sadd.s32 1, %s1277_s26 }
   0x7   : > { %s164_s9 = ssub.s32 %s1281_s27, %s1357_s30  ;;  %p177_p0 = scmp.ne.s32.totalorder %s1277_s26, %s1273_s25 }
   0x8   : > { %p165_p1 = scmp.eq.s32.totalorder %s164_s9, 0  ;;  %p178_p2 = scmp.eq.s32.totalorder %s1353_s28, 1 }
   0x9   : > { %p183_p3 = scmp.ne.s32.totalorder %s1273_s25, %s1269_s24  ;;  %p184_p4 = scmp.eq.s32.totalorder %s1022_s29, 1 }
   0xa   : > { %s1368_s10 = scalar_select %p165_p1, %s1277_s26, %s167_s8  }
   0xb   : > { %p1370_p5 = por %p178_p2, %p177_p0  ;;  %p1374_p6 = por %p184_p4, %p183_p3 }
   0xc   : > { %p1025_p7 = scmp.ge.s32.totalorder %s1281_s27, 1  ;;  %p258_p8 = scmp.lt.s32.totalorder %s1281_s27, 3 }
   0xe   : > { %p259_p9 = pnand %p1025_p7, %p258_p8 }
   0xf   : > { %v422_v0 = vld [vmem:[%s1584_s3] sm:$0xff] (!%p259_p9)  ;;  %v423_v1 = vld [vmem:[%s1584_s3 + $0x8] sm:$0xff] (!%p259_p9)  ;;  %v438_v3 = vlaneseq (!%p259_p9)  ;;  %v1283_v4 = vmov (!%p259_p9), 0.0|0.0   ;;  %vm1284_vm0 = vmmov (!%p259_p9), 0   ;;  %v1285_v7 = vmov (!%p259_p9), 0.0   ;;  %v322_v8 = vld [vmem:[%s1583_s2 + $0x10] sm:$0xff] (!%p259_p9) }
  0x10   : > { %262 = sbr.rel (%p259_p9) target bundleno = 1238 (0x4d6), region = 44  ;;  %v320_v2 = vld [vmem:[%s1583_s2] sm:$0xff] (!%p259_p9)  ;;  %1115 = vmatprep.subr.bf16.mxu1 (!%p259_p9), %v1283_v4  ;;  %v1116_v5 = vpack.c.bf16 (!%p259_p9), %v423_v1, %v422_v0  ;;  %v321_v6 = vld [vmem:[%s1583_s2 + $0x8] sm:$0xff] (!%p259_p9)  ;;  %1090 = vmatprep.mubr.msk.f32.mxu1 (!%p259_p9), %vm1284_vm0, %v1285_v7  ;;  %s1028_s23 = sshll.u32 (!%p259_p9), %s1353_s28, 1  ;;  %v323_v10 = vld [vmem:[%s1583_s2 + $0x18] sm:$0xff] (!%p259_p9)  ;;  %vm324_vm1 = vcmask (!%p259_p9), 261120  }
  0x11   : > { %v1107_v9 = vpack.c.bf16 (!%p259_p9), %v321_v6, %v320_v2  ;;  %p301_p10 = scmp.lt.s32.totalorder (!%p259_p9), %s1028_s23, 3  ;;  %v1286_v11 = vmov (!%p259_p9), 1966171168   ;;  %v1402_v13 = vshrl.u32 (!%p259_p9), %v438_v3, 7  ;;  %v1111_v14 = vpack.c.bf16 (!%p259_p9), %v323_v10, %v322_v8  ;;  %v424_v15 = vld [vmem:[%s1584_s3 + $0x10] sm:$0xff] (!%p259_p9)  ;;  %s1471_s8 = sand.u32 (!%p259_p9), 1, %s1273_s25  }
  0x12   : > { %v436_v12 = vunpack.c.l.s4 (!%p259_p9), %v1286_v11  ;;  %1117 = vmatpush3.bf16.msra.mxu1 (!%p259_p9), %v1116_v5  ;;  %vm449_vm2 = vcmask (!%p259_p9), 195584   ;;  %v1036_v29 = vld [vmem:[%s1585_s4] ss:$0 sm:$0xff] (!%p259_p9)  ;;  %vm574_vm3 = vcmask (!%p259_p9), 130048   ;;  %v592_v61 = vand.u32 (!%p259_p9), 127, %v438_v3  ;;  %s1026_s9 = sshll.u32 (!%p259_p9), %s1471_s8, 1 }
  0x13   : > { %1108 = vmatprep.subr.bf16.mxu0 (!%p259_p9), %v1107_v9  ;;  %1088 = vmatprep.subr.mxu1 (!%p259_p9), %v1285_v7  ;;  %v1433_v37 = vsub.s32 (!%p259_p9), 0, %v1402_v13  ;;  %v1038_v46 = vld [vmem:[%s1586_s5] ss:$0 sm:$0xff] (!%p259_p9)  ;;  %vm602_vm4 = vcmask (!%p259_p9), 130112   ;;  %vm613_vm5 = vcmask (!%p259_p9), 1041409   ;;  %vm616_vm6 = vcmask (!%p259_p9), 123904  }
  0x14   : > { %v437_v16 = vunpack.c.0.s8 (!%p259_p9), %v436_v12  ;;  %1110 = vmatpush3.bf16.msra.mxu0 (!%p259_p9), %v1107_v9  ;;  %v597_v62 = vadd.s32 (!%p259_p9), 4294967288, %v592_v61  ;;  %v1449_v2 = vsub.s32 (!%p259_p9), %v592_v61, %v1402_v13  ;;  %vm881_vm7 = vcmask (!%p259_p9), 122880   ;;  %s299_s13 = scalar_lea.vmem (!%p259_p9), [#allocation4], %s1026_s9  ;;  %s1050_s15 = sshll.u32 (!%p259_p9), %s1353_s28, 5 }
  0x15   : > { %1112 = vmatprep.subr.bf16.mxu0 (!%p259_p9), %v1111_v14  ;;  %s919_s14 = sshll.u32 (!%p259_p9), %s299_s13, 4  ;;  %s1497_s18 = scalar_lea.hbm (!%p259_p9), %s1588_s7, %s1050_s15  ;;  %s1489_s14 = int_to_ptr.vmem [resolvable:$true] %s919_s14 }
  0x16   : > { %v440_v17 = vsub.s32 (!%p259_p9), %v437_v16, %v1402_v13  ;;  %1089 = vmatpush3.msra.mxu1 (!%p259_p9), %v424_v15  ;;  %v1446_v0 = vsub.s32 (!%p259_p9), %v597_v62, %v1402_v13  ;;  %v1287_v15 = vmov (!%p259_p9), 0   ;;  %v627_v16 = vsub.s32 (!%p259_p9), 1, %v1402_v13  ;;  %s890_s19 = scalar_lea.sflag (!%p259_p9), [#allocation5], %s1471_s8  ;;  %s1288_s21 = smov (!%p259_p9), [#allocation4]  }
  0x17   : > { %s1596_s23 = smov (!%p301_p10, %s1028_s23), 3  ;;  %1118 = vmatprep.subr.bf16.mxu1 %v1283_v4  ;;  %1176 = vset.pattern.permute.xlu0 %v1287_v15  ;;  %s1191_s22 = sshll.u32 %s1288_s21, 4  ;;  %s1192_s22 = int_to_ptr.vmem [resolvable:$false] %s1191_s22 }
  0x18   : > { %s310_s16 = scalar_lea.vmem %s1582_s1, %s1596_s23  ;;  %s1049_s17 = sshll.u32 %s1596_s23, 4  ;;  %1114 = vmatpush3.bf16.msra.mxu0 %v1111_v14  ;;  %1175 = vset.pattern.permute.xlu1 %v1287_v15 }
  0x19   : > { %v318_v18 = vld [vmem:[%s310_s16] sm:$0x1]  ;;  %v319_v19 = vld [vmem:[%s310_s16 + $0x1] sm:$0x1]  ;;  %s305_s20 = scalar_lea.vmem %s1581_s0, %s1049_s17  ;;  %s1193_s23 = scalar_lea.vmem %s1192_s22, 64 }
  0x1a   : > { %v434_v20 = vcombine.low %v318_v18, %v319_v19  ;;  %v314_v21 = vld [vmem:[%s305_s20] sm:$0xff]  ;;  %v315_v22 = vld [vmem:[%s305_s20 + $0x8] sm:$0xff]  ;;  %v1416_v23 = vld [vmem:[%s305_s20 + $0x10] sm:$0xff]  ;;  %p1194_p0 = scmp.lt.s32.totalorder %s1489_s14, %s1192_s22 }
  0x1b   : > { %1078 = vmatprep.mubr.msk.f32.mxu0 %vm324_vm1, %v314_v21  ;;  %v1418_v24 = vld [vmem:[%s305_s20 + $0x18] sm:$0xff]  ;;  %v1119_v27 = vpack.c.bf16 %v315_v22, %v314_v21  ;;  %s1187_s20 = scalar_lea.vmem %s1489_s14, 32 }
  0x1c   : > { %v441_v25 = vrot.slane %v434_v20, %v440_v17  ;;  %v1122_v26 = vpack.c.bf16 %v1418_v24, %v1416_v23  ;;  %1079 = vmatmul.mubr.msk.f32.vlgmr.msra.gmra.mrb[0].mxu0 %vm324_vm1, %v315_v22  ;;  %p1188_p11 = scmp.ne.s32.totalorder %s1489_s14, %s1187_s20  ;;  %p1195_p1 = scmp.lt.s32.totalorder %s1193_s23, %s1187_s20 }
  0x1d   : > { %1081 = vmatprep.mubr.msk.f32.mxu0 %vm324_vm1, %v1416_v23 }
  0x1e   : > { %v448_v28 = vrot.slane %v441_v25, %v440_v17  ;;  %p1189_p12 = pnand %p1188_p11, %p1370_p5  ;;  %p1196_p2 = por %p1195_p1, %p1194_p0 }
  0x20   : > { %1091 = vmatmul.mubr.msk.f32.vlgmr.msra.gmra.mrb[0].mxu1 %vm449_vm2, %v448_v28  ;;  %1082 = vmatmul.mubr.msk.f32.gmra.mrb[2].mxu0 %vm324_vm1, %v1418_v24  ;;  %p1190_p13 = pneg %p1189_p12 }
  0x21   : > { %1120 = vmatpush3.bf16.msra.mxu1 %v1119_v27  ;;  %1097 = vmatprep.mubr.msk.f32.mxu1 %vm1284_vm0, %v1285_v7 }
  0x22   : > { %1121 = vmatprep.subr.bf16.mxu1 %v1283_v4  ;;  %p1197_p3 = pnand %p1196_p2, %p1190_p13 }
  0xef   : > { %v1080_v30 = vpop.f32.mrb[0].mxu0 }
  0xf0   : > { %v403_v31 = vpop.f32.mrb[1].mxu0 }
  0xf3   : > { %v518_v32 = vpop.f32.mrb[0].mxu1  ;;  %v1083_v35 = vpop.f32.mrb[2].mxu0 }
  0xf4   : > { %v519_v33 = vadd.f32 %v1036_v29, %v518_v32  ;;  %v1092_v34 = vpop.f32.mrb[1].mxu1  ;;  %v413_v38 = vpop.f32.mrb[3].mxu0 }
  0xf6   : > { %v529_v36 = vrot.slane %v519_v33, %v440_v17 }
  0xf8   : > { %v530_v39 = vcombine.high %v529_v36, %v529_v36  ;;  %v537_v40 = vrot.slane %v529_v36, %v440_v17 }
  0xfa   : > { %v548_v41 = vrot.slane %v537_v40, %v1433_v37  ;;  %v544_v42 = vrot.slane %v530_v39, %v440_v17 }
  0xfc   : > { %v556_v43 = vadd.f32 %v1080_v30, %v548_v41  ;;  %v555_v44 = vadd.f32 %v548_v41, %v403_v31  ;;  %v552_v45 = vrot.slane %v544_v42, %v1433_v37 }
  0xfe   : > { %v560_v47 = vmax.f32 %v556_v43, 0.0  ;;  %v559_v48 = vmax.f32 %v555_v44, 0.0  ;;  %v558_v49 = vadd.f32 %v1083_v35, %v552_v45  ;;  %v557_v50 = vadd.f32 %v552_v45, %v413_v38 }
 0x100   : > { %v562_v51 = vmax.f32 %v558_v49, 0.0  ;;  %v561_v52 = vmax.f32 %v557_v50, 0.0  ;;  %v570_v53 = vmul.f32 %v1038_v46, %v559_v48  ;;  %v571_v56 = vmul.f32 %v1038_v46, %v560_v47 }
 0x102   : > { %v575_v54 = vsel %vm574_vm3, %v570_v53, 0.0  ;;  %v572_v55 = vmul.f32 %v1038_v46, %v561_v52  ;;  %v573_v58 = vmul.f32 %v1038_v46, %v562_v51  ;;  %v578_v59 = vsel %vm574_vm3, %v571_v56, 0.0 }
 0x103   : > { %576 = vadd.xlane.f32.xlu0 %v575_v54 }
 0x104   : > { %v581_v57 = vsel %vm574_vm3, %v572_v55, 0.0  ;;  %v584_v60 = vsel %vm574_vm3, %v573_v58, 0.0 }
 0x105   : > { %582 = vadd.xlane.f32.xlu1 %v581_v57 }
 0x107   : > { %579 = vadd.xlane.f32.xlu0 %v578_v59 }
 0x109   : > { %585 = vadd.xlane.f32.xlu1 %v584_v60 }
 0x190   : > { %v577_v63 = vpop.xlane.xlu0 %576 }
 0x191   : > { %v596_v8 = vrot.slane %v577_v63, %v1449_v2 }
 0x192   : > { %v583_v1 = vpop.xlane.xlu1 %582 }
 0x193   : > { %v607_v9 = vrot.slane %v583_v1, %v1449_v2 }
 0x194   : > { %v580_v4 = vpop.xlane.xlu0 %579 }
 0x195   : > { %v601_v5 = vrot.slane %v580_v4, %v1446_v0 }
 0x196   : > { %v586_v6 = vpop.xlane.xlu1 %585 }
 0x197   : > { %v611_v3 = vrot.slane %v586_v6, %v1446_v0  ;;  %v603_v10 = vsel %vm602_vm4, %v601_v5, %v596_v8 }
 0x199   : > { %v612_v11 = vsel %vm602_vm4, %v611_v3, %v607_v9 }
 0x19a   : > { %v614_v12 = vsel %vm613_vm5, %v612_v11, %v603_v10 }
 0x19b   : > { %v617_v14 = vsel %vm616_vm6, %v614_v12, -inf }
 0x19c   : > { %618 = vmax.xlane.f32.xlu0 %v617_v14 }
 0x229   : > { %v619_v17 = vpop.xlane.xlu0 %618 }
 0x22a   : > { %v624_v18 = vrot.slane %v619_v17, %v1433_v37  ;;  %v628_v19 = vrot.slane %v619_v17, %v627_v16 }
 0x22c   : > { %v631_v20 = vsub.f32 %v577_v63, %v624_v18  ;;  %v632_v21 = vsub.f32 %v580_v4, %v624_v18  ;;  %v633_v22 = vsub.f32 %v583_v1, %v628_v19  ;;  %v634_v28 = vsub.f32 %v586_v6, %v628_v19 }
 0x22e   : > { %v635_v25 = vmul.f32 1.442695, %v631_v20  ;;  %v637_v27 = vmul.f32 1.442695, %v632_v21  ;;  %v639_v29 = vmul.f32 1.442695, %v633_v22 }
 0x22f   : > { %v641_v30 = vmul.f32 1.442695, %v634_v28 }
 0x230   : > { %1177 = vpow2.f32 %v635_v25 }
 0x231   : > { %1179 = vpow2.f32 %v637_v27 }
 0x232   : > { %1181 = vpow2.f32 %v639_v29 }
 0x233   : > { %1183 = vpow2.f32 %v641_v30 }
 0x23a   : > { %v1178_v31 = vpop.eup %1177 }
 0x23b   : > { %v1180_v32 = vpop.eup %1179  ;;  %648 = vperm.xlu1 %1175, %v1178_v31  }
 0x23c   : > { %651 = vperm.xlu0 %1176, %v1180_v32   ;;  %v1182_v13 = vpop.eup %1181 }
 0x23d   : > { %v1184_v33 = vpop.eup %1183 }
 0x23f   : > { %654 = vperm.xlu1 %1175, %v1182_v13  }
 0x243   : > { %657 = vperm.xlu1 %1175, %v1184_v33  }
 0x2ba   : > { %v649_v34 = vpop.permute.xlu1 %648 }
 0x2bb   : > { %v652_v35 = vpop.permute.xlu0 %651  ;;  %v662_v39 = vrot.slane %v649_v34, %v1449_v2 }
 0x2bc   : > { %v666_v38 = vrot.slane %v652_v35, %v1446_v0 }
 0x2be   : > { %v655_v36 = vpop.permute.xlu1 %654  ;;  %v667_v43 = vsel %vm602_vm4, %v666_v38, %v662_v39 }
 0x2bf   : > { %v671_v41 = vrot.slane %v655_v36, %v1449_v2 }
 0x2c2   : > { %v658_v40 = vpop.permute.xlu1 %657 }
 0x2c3   : > { %v675_v42 = vrot.slane %v658_v40, %v1446_v0 }
 0x2c5   : > { %v676_v44 = vsel %vm602_vm4, %v675_v42, %v671_v41 }
 0x2c6   : > { %v677_v45 = vsel %vm613_vm5, %v676_v44, %v667_v43 }
 0x2c7   : > { %v679_v46 = vsel %vm616_vm6, %v677_v45, 0.0 }
 0x2c8   : > { %680 = vadd.xlane.f32.xlu1 %v679_v46 }
 0x355   : > { %v681_v47 = vpop.xlane.xlu1 %680 }
 0x356   : > { %1185 = vrcp.f32 %v681_v47 }
 0x360   : > { %v1186_v48 = vpop.eup %1185 }
 0x361   : > { %v687_v49 = vrot.slane %v1186_v48, %v1433_v37  ;;  %v691_v52 = vrot.slane %v1186_v48, %v627_v16 }
 0x363   : > { %v694_v50 = vmul.f32 %v1178_v31, %v687_v49  ;;  %v695_v51 = vmul.f32 %v1180_v32, %v687_v49  ;;  %v696_v53 = vmul.f32 %v1182_v13, %v691_v52  ;;  %v697_v54 = vmul.f32 %v1184_v33, %v691_v52 }
 0x365   : > { %701 = vperm.xlu0 %1176, %v694_v50  }
 0x369   : > { %704 = vperm.xlu0 %1176, %v695_v51  }
 0x36d   : > { %790 = vperm.xlu0 %1176, %v696_v53  }
 0x371   : > { %793 = vperm.xlu0 %1176, %v697_v54  }
 0x3e4   : > { %v702_v55 = vpop.permute.xlu0 %701 }
 0x3e5   : > { %v709_v57 = vrot.slane %v702_v55, %v1449_v2 }
 0x3e8   : > { %v705_v56 = vpop.permute.xlu0 %704 }
 0x3e9   : > { %v713_v37 = vrot.slane %v705_v56, %v1446_v0 }
 0x3eb   : > { %v714_v58 = vsel %vm602_vm4, %v713_v37, %v709_v57 }
 0x3ec   : > { %1098 = vmatmul.mubr.msk.f32.vlgmr.msra.gmra.mrb[2].mxu1 %vm574_vm3, %v714_v58  ;;  %v791_v59 = vpop.permute.xlu0 %790  ;;  %882 = vst.msk [vmem:[%s299_s13] sm:$0x1] %vm881_vm7, %v714_v58 }
 0x3ed   : > { %1123 = vmatpush3.bf16.msra.mxu1 %v1122_v26  ;;  %1104 = vmatprep.mubr.msk.f32.mxu1 %vm1284_vm0, %v1285_v7  ;;  %v798_v61 = vrot.slane %v791_v59, %v1449_v2 }
 0x3f0   : > { %v794_v60 = vpop.permute.xlu0 %793 }
 0x3f1   : > { %v802_v62 = vrot.slane %v794_v60, %v1446_v0 }
 0x3f3   : > { %v803_v63 = vsel %vm602_vm4, %v802_v62, %v798_v61 }
 0x3f4   : > { %1105 = vmatmul.mubr.msk.f32.vlgmr.msra.gmra.mrb[4].mxu1 %vm574_vm3, %v803_v63  ;;  %883 = vst.msk [vmem:[%s299_s13 + $0x1] sm:$0x1] %vm881_vm7, %v803_v63 }
 0x3f5   : > { %1200 = shalt.err (!%p1197_p3)
}
 0x3f6   : > { %s1201_s29 = scalar_lea.hbm %s1497_s18, 32  ;;  %s1205_s17 = scalar_lea.hbm %s1588_s7, 64 }
 0x3f7   : > { %p1202_p4 = scmp.ne.s32.totalorder %s1497_s18, %s1201_s29  ;;  %p1206_p9 = scmp.lt.u32.totalorder %s1497_s18, %s1588_s7 }
 0x3f8   : > { %p1207_p10 = scmp.lt.u32.totalorder %s1205_s17, %s1201_s29  ;;  %p1209_p12 = scmp.lt.u32.totalorder %s1201_s29, %s1497_s18 }
 0x3f9   : > { %p1203_p7 = pnand %p1202_p4, %p1370_p5 }
 0x3fa   : > { %p1208_p11 = por %p1207_p10, %p1206_p9 }
 0x3fb   : > { %p1204_p8 = pneg %p1203_p7 }
 0x3fc   : > { %p1210_p13 = por %p1209_p12, %p1208_p11 }
 0x3fe   : > { %p1211_p0 = pnand %p1210_p13, %p1204_p8 }
 0x400   : > { %1214 = shalt.err (!%p1211_p0)
}
 0x401   : > { %s1289_s20 = smov 16   ;;  %s1290_s23 = smov 1   ;;  %vm876_vm8 = vcmask 253952  }
 0x402   : > { %1125 = dma.vmem_to_hbm [thread:$0]  (%p1370_p5), %s1489_s14, 32, %s1497_s18, %s890_s19, %s1289_s20, %s1289_s20, %s1290_s23  }
 0x403   : > { %s292_s29 = scalar_lea.vmem [#allocation2], %s1026_s9  ;;  %s1535_s21 = scalar_lea.hbm %s1587_s6, %s1050_s15 }
 0x404   : > { %s903_s13 = sshll.u32 %s292_s29, 4  ;;  %s885_s14 = scalar_lea.sflag [#allocation3], %s1471_s8  ;;  %s1528_s13 = int_to_ptr.vmem [resolvable:$true] %s903_s13 }
 0x405   : > { %s1215_s18 = scalar_lea.vmem %s1528_s13, 32  ;;  %s1291_s9 = smov [#allocation2]  }
 0x406   : > { %p1216_p1 = scmp.ne.s32.totalorder %s1528_s13, %s1215_s18  ;;  %s1219_s19 = sshll.u32 %s1291_s9, 4  ;;  %s1220_s19 = int_to_ptr.vmem [resolvable:$false] %s1219_s19 }
 0x407   : > { %s1221_s28 = scalar_lea.vmem %s1220_s19, 64  ;;  %p1222_p4 = scmp.lt.s32.totalorder %s1528_s13, %s1220_s19 }
 0x408   : > { %p1217_p2 = pnand %p1216_p1, %p1370_p5  ;;  %p1223_p7 = scmp.lt.s32.totalorder %s1221_s28, %s1215_s18 }
 0x40a   : > { %p1218_p3 = pneg %p1217_p2  ;;  %p1224_p8 = por %p1223_p7, %p1222_p4 }
 0x40c   : > { %p1225_p9 = pnand %p1224_p8, %p1218_p3 }
 0x4bf   : > { %v783_v7 = vpop.f32.mrb[2].mxu1 }
 0x4c0   : > { %877 = vst.msk [vmem:[%s292_s29] sm:$0x1] %vm876_vm8, %v783_v7  ;;  %v1099_v23 = vpop.f32.mrb[3].mxu1 }
 0x4c7   : > { %v872_v24 = vpop.f32.mrb[4].mxu1 }
 0x4c8   : > { %878 = vst.msk [vmem:[%s292_s29 + $0x1] sm:$0x1] %vm876_vm8, %v872_v24  ;;  %v1106_v26 = vpop.f32.mrb[5].mxu1 }
 0x4c9   : > { %1228 = shalt.err (!%p1225_p9)
}
 0x4ca   : > { %s1229_s15 = scalar_lea.hbm %s1535_s21, 32  ;;  %s1233_s16 = scalar_lea.hbm %s1587_s6, 64 }
 0x4cb   : > { %p1230_p10 = scmp.ne.s32.totalorder %s1535_s21, %s1229_s15  ;;  %p1234_p13 = scmp.lt.u32.totalorder %s1535_s21, %s1587_s6 }
 0x4cc   : > { %p1235_p0 = scmp.lt.u32.totalorder %s1233_s16, %s1229_s15  ;;  %p1237_p2 = scmp.lt.u32.totalorder %s1229_s15, %s1535_s21 }
 0x4cd   : > { %p1231_p11 = pnand %p1230_p10, %p1370_p5 }
 0x4ce   : > { %p1236_p1 = por %p1235_p0, %p1234_p13 }
 0x4cf   : > { %p1232_p12 = pneg %p1231_p11 }
 0x4d0   : > { %p1238_p3 = por %p1237_p2, %p1236_p1 }
 0x4d2   : > { %p1239_p4 = pnand %p1238_p3, %p1232_p12 }
 0x4d4   : > { %1242 = shalt.err (!%p1239_p4)
}
 0x4d5   : > { %1124 = dma.vmem_to_hbm [thread:$0]  (%p1370_p5), %s1528_s13, 32, %s1535_s21, %s885_s14, %s1289_s20, %s1289_s20, %s1290_s23  }
 0x4d6 PF: > { %p1135_p7 = scmp.ge.s32.totalorder %s1281_s27, 2  ;;  %s934_s18 = sand.u32 1, %s1269_s24  }
 0x4d7   : > { %s935_s19 = scalar_lea.sflag [#allocation3], %s934_s18 }
 0x4d8   : > { %p1129_p8 = pnand %p1135_p7, %p1374_p6 }
 0x4da   : > { %1260 = dma.done.wait (!%p1129_p8), %s935_s19, 32  }
 0x4db   : > { %1262 = vsyncadd (!%p1129_p8), %s935_s19, 4294967264  ;;  %s944_s11 = scalar_lea.sflag [#allocation5], %s934_s18 }
 0x4dc   : > { %1264 = dma.done.wait (!%p1129_p8), %s944_s11, 32  }
 0x4dd   : > { %1266 = vsyncadd (!%p1129_p8), %s944_s11, 4294967264  ;;  %p21_p5 = scmp.ge.s32.totalorder %s1357_s30, 4   ;;  %s1591_s24 = smov %s1273_s25 }
 0x4de   : > { %s1592_s25 = smov %s1277_s26  ;;  %s1593_s26 = smov %s1368_s10 }
 0x4df   : > { %s1594_s27 = smov %s1357_s30  ;;  %23 = sbr.rel (!%p21_p5) target bundleno = 5 (0x5), region = 99 }
 0x4e6   :  { %949 = vsyncpa [#allocation3], 1 }
 0x4e7   :  { %951 = vsyncpa [#allocation3 + $0x1], 1 }
 0x4e8   :  { %952 = vsyncpa [#allocation5], 1 }
 0x4e9   :  { %954 = vsyncpa [#allocation5 + $0x1], 1 }

</bundles_post_ra>
